<compile_context>
chip_gen: v6e
topology: v6e:2x2x1
jax: 0.10.0
libtpu: 0.0.40
codegen_flags: <defaults>
</compile_context>

<pallas_src>
import functools
import math

import jax
import jax.numpy as jnp
from jax.experimental import pallas as pl
from jax.experimental.pallas import tpu as pltpu


# ---------------------------------------------------------------------------
# helpers
# ---------------------------------------------------------------------------
def _round_up(x, m):
    return (x + m - 1) // m * m


def _pick_tile(n, align, cap):
    """Largest multiple of `align` that divides n and is <= cap; else n (full dim)."""
    top = min(cap, n) // align * align
    for d in range(top, 0, -align):
        if n % d == 0:
            return d
    return n


@functools.lru_cache(maxsize=None)
def _tn_pref():
    """Preferred N tile: 128 on v5e (4x 128x128 MXU), 256 on v6e/v7x (256-wide MXU)."""
    try:
        kind = jax.devices()[0].device_kind.lower()
    except Exception:
        return 256
    if "v5e" in kind or "v5 lite" in kind or "v5lite" in kind:
        return 128
    return 256


def _window_geom(H, W):
    """Geometry for the row-flattened, H-padded image used by the 3x3 window kernels."""
    hw = H * W
    hwp = _round_up(hw, 8)
    p_t = 2                                   # 1 conv-pad row + 1 slack row on top
    offs = tuple((di + 1) * W + dj - 1 for di in range(3) for dj in range(3))
    pad_bot = 2
    while ((p_t + H + pad_bot) * W) % 8 != 0 or \
            (p_t + H + pad_bot) * W < max(offs) + hwp:
        pad_bot += 1
    flat_p = (p_t + H + pad_bot) * W
    assert max(offs) + hwp <= flat_p
    tr = _pick_tile(hwp, 8, 128)              # row sub-tile (bounds vreg pressure)
    return hw, hwp, p_t, offs, flat_p, tr


def _build_padded_image(xpad_ref, x_ref, head, hw, fill):
    """Fill pad rows with `fill` and copy the (hw, c) image into the VMEM scratch."""
    cin = xpad_ref.shape[1]
    flat_p = xpad_ref.shape[0]
    tail = flat_p - head - hw
    xpad_ref[pl.ds(0, head), :] = jnp.full((head, cin), fill, xpad_ref.dtype)
    if tail:
        xpad_ref[pl.ds(head + hw, tail), :] = jnp.full((tail, cin), fill,
                                                       xpad_ref.dtype)
    step = 256
    for s in range(0, hw, step):
        sz = min(step, hw - s)
        xpad_ref[pl.ds(head + s, sz), :] = x_ref[0, pl.ds(s, sz), :]


# ---------------------------------------------------------------------------
# tiled matmul + bias (+ optional fused residual add) (+ optional ReLU)
# single full-K step: no K grid axis, no accumulator scratch
# ---------------------------------------------------------------------------
def _matmul_kernel(a_ref, w_ref, bias_ref, *rest, relu, has_res):
    if has_res:
        res_ref, o_ref = rest
    else:
        res_ref = None
        (o_ref,) = rest
    y = jnp.dot(a_ref[...], w_ref[...], preferred_element_type=jnp.float32)
    y = y + bias_ref[...]
    if has_res:
        y = y + res_ref[...].astype(jnp.float32)
    if relu:
        y = jnp.maximum(y, 0.0)
    o_ref[...] = y.astype(o_ref.dtype)


def matmul_bias(a, w, bias, *, relu=False, residual=None, out_dtype=jnp.bfloat16):
    """out = relu?(a @ w + bias (+ residual)); a:(M,K) bf16, w:(K,N) bf16, bias:(1,N) f32."""
    M, K = a.shape
    Kw, Np = w.shape
    assert K == Kw, (K, Kw)
    tn_pref = _tn_pref()
    tn = tn_pref if Np % tn_pref == 0 else (128 if Np % 128 == 0 else Np)
    tm = _pick_tile(M, 8, min(256, 32768 // tn))      # epilogue tile <= 32 f32 vregs
    if M // tm == 1 and Np // tn == 1 and M >= 16:
        # expose >=2 grid tiles so both v7x TensorCores get work
        tm = _pick_tile(M, 8, max(8, _round_up(M // 2, 8)))
    grid = (Np // tn, M // tm)                        # M innermost -> weight DMA dedup

    in_specs = [pl.BlockSpec((tm, K), lambda j, i: (i, 0)),
                pl.BlockSpec((K, tn), lambda j, i: (0, j)),
                pl.BlockSpec((1, tn), lambda j, i: (0, j))]
    args = [a, w, bias]
    if residual is not None:
        assert residual.shape == (M, Np), (residual.shape, (M, Np))
        in_specs.append(pl.BlockSpec((tm, tn), lambda j, i: (i, j)))
        args.append(residual)

    return pl.pallas_call(
        functools.partial(_matmul_kernel, relu=relu,
                          has_res=residual is not None),
        out_shape=jax.ShapeDtypeStruct((M, Np), out_dtype),
        grid_spec=pltpu.PrefetchScalarGridSpec(
            num_scalar_prefetch=0,
            grid=grid,
            in_specs=in_specs,
            out_specs=pl.BlockSpec((tm, tn), lambda j, i: (i, j))),
        compiler_params=pltpu.CompilerParams(
            dimension_semantics=("parallel", "parallel")),
    )(*args)


# ---------------------------------------------------------------------------
# im2col-free 3x3 / stride-1 / pad-1 conv (+ folded BN bias + ReLU)
# padded flat image built in VMEM, masks generated in-kernel
# ---------------------------------------------------------------------------
def _conv3x3_kernel(x_ref, w_ref, b_ref, o_ref, xpad_ref, *,
                    cin, W, hw, hwp, tr, p_t, offs, relu):
    k = 3
    _build_padded_image(xpad_ref, x_ref, p_t * W, hw, 0.0)
    for s in range(hwp // tr):
        base = s * tr
        col = (jax.lax.broadcasted_iota(jnp.int32, (tr, 1), 0) + base) % W
        not_l = col != 0
        not_r = col != (W - 1)
        acc = None
        for t, off in enumerate(offs):
            dj = t % k
            a = xpad_ref[pl.ds(base + off, tr), :]
            if dj == 0:
                a = jnp.where(not_l, a, jnp.zeros((), a.dtype))
            elif dj == k - 1:
                a = jnp.where(not_r, a, jnp.zeros((), a.dtype))
            wt = w_ref[pl.ds(t * cin, cin), :]
            d = jnp.dot(a, wt, preferred_element_type=jnp.float32)
            acc = d if acc is None else acc + d
        y = acc + b_ref[...]
        if relu:
            y = jnp.maximum(y, 0.0)
        o_ref[pl.ds(base, tr), :] = y.astype(o_ref.dtype)


def conv3x3_s1(x, p, *, relu=True):
    """3x3 stride-1 pad-1 conv: no im2col, no XLA-side padding of the activation."""
    n, H, W, c = x.shape
    hw, hwp, p_t, offs, flat_p, tr = _window_geom(H, W)
    cout_p = p["w"].shape[1]
    tn_pref = _tn_pref()
    tn = tn_pref if cout_p % tn_pref == 0 else 128
    xf = x.reshape(n, hw, c)

    out = pl.pallas_call(
        functools.partial(_conv3x3_kernel, cin=c, W=W, hw=hw, hwp=hwp, tr=tr,
                          p_t=p_t, offs=offs, relu=relu),
        out_shape=jax.ShapeDtypeStruct((n * hwp, cout_p), jnp.bfloat16),
        grid_spec=pltpu.PrefetchScalarGridSpec(
            num_scalar_prefetch=0,
            # channel tile outer, batch innermost: weight slab DMA deduped across batch
            grid=(cout_p // tn, n),
            in_specs=[
                pl.BlockSpec((1, hw, c), lambda j, b: (b, 0, 0)),
                pl.BlockSpec((9 * c, tn), lambda j, b: (0, j)),
                pl.BlockSpec((1, tn), lambda j, b: (0, j)),
            ],
            out_specs=pl.BlockSpec((hwp, tn), lambda j, b: (b, j)),
            scratch_shapes=[pltpu.VMEM((flat_p, c), jnp.bfloat16)]),
        compiler_params=pltpu.CompilerParams(
            dimension_semantics=("parallel", "parallel")),
    )(xf, p["w"], p["b"])
    out = out.reshape(n, hwp, cout_p)
    if hwp != hw:
        out = out[:, :hw, :]
    return out.reshape(n, H, W, cout_p)


# ---------------------------------------------------------------------------
# im2col fallback (only the 7x7/s2 stem and the three 3x3/s2 convs use this)
# ---------------------------------------------------------------------------
def _im2col(x, k, stride, pad, k_rows=None):
    n, h, w, c = x.shape
    if pad:
        x = jnp.pad(x, ((0, 0), (pad, pad), (pad, pad), (0, 0)))
    oh = (h + 2 * pad - k) // stride + 1
    ow = (w + 2 * pad - k) // stride + 1
    cols = [x[:, i:i + stride * oh:stride, j:j + stride * ow:stride, :]
            for i in range(k) for j in range(k)]
    kk = k * k * c
    if k_rows is not None and k_rows > kk:
        # zero-pad the contraction dim (e.g. stem 147 -> 256) for an aligned MXU K
        cols.append(jnp.zeros((n, oh, ow, k_rows - kk), x.dtype))
        kk = k_rows
    patches = jnp.concatenate(cols, axis=-1)
    return patches.reshape(n * oh * ow, kk), (n, oh, ow)


def conv_im2col(x, p, *, k, stride, pad, relu):
    a, (n, oh, ow) = _im2col(x, k, stride, pad, k_rows=p["w"].shape[0])
    out = matmul_bias(a, p["w"], p["b"], relu=relu)
    return out.reshape(n, oh, ow, -1)


# ---------------------------------------------------------------------------
# 1x1 conv (pure matmul) with optional fused residual+ReLU epilogue
# ---------------------------------------------------------------------------
def conv1x1(x, p, *, stride=1, relu=False, residual=None):
    if stride > 1:
        x = x[:, ::stride, ::stride, :]
    n, h, w, c = x.shape
    a = x.reshape(n * h * w, c)
    res = None if residual is None else residual.reshape(n * h * w, -1)
    out = matmul_bias(a, p["w"], p["b"], relu=relu, residual=res)
    return out.reshape(n, h, w, -1)


# ---------------------------------------------------------------------------
# maxpool 3x3 / stride 2 / pad 1: one kernel (padded image built in VMEM,
# full-resolution 3x3 max), then a single XLA stride-2 subsample
# ---------------------------------------------------------------------------
def _maxpool_kernel(x_ref, o_ref, xpad_ref, *, W, hw, hwp, tr, p_t, offs):
    neg = jnp.asarray(-jnp.inf, xpad_ref.dtype)
    _build_padded_image(xpad_ref, x_ref, p_t * W, hw, -jnp.inf)
    for s in range(hwp // tr):
        base = s * tr
        col = (jax.lax.broadcasted_iota(jnp.int32, (tr, 1), 0) + base) % W
        not_l = col != 0
        not_r = col != (W - 1)
        m = None
        for t, off in enumerate(offs):
            dj = t % 3
            a = xpad_ref[pl.ds(base + off, tr), :]
            if dj == 0:
                a = jnp.where(not_l, a, neg)
            elif dj == 2:
                a = jnp.where(not_r, a, neg)
            m = a if m is None else jnp.maximum(m, a)
        o_ref[pl.ds(base, tr), :] = m


def maxpool_3x3_s2(x):
    n, H, W, c = x.shape
    hw, hwp, p_t, offs, flat_p, tr = _window_geom(H, W)
    xf = x.reshape(n, hw, c)
    full = pl.pallas_call(
        functools.partial(_maxpool_kernel, W=W, hw=hw, hwp=hwp, tr=tr,
                          p_t=p_t, offs=offs),
        out_shape=jax.ShapeDtypeStruct((n * hwp, c), x.dtype),
        grid_spec=pltpu.PrefetchScalarGridSpec(
            num_scalar_prefetch=0,
            grid=(n,),
            in_specs=[pl.BlockSpec((1, hw, c), lambda b: (b, 0, 0))],
            out_specs=pl.BlockSpec((hwp, c), lambda b: (b, 0)),
            scratch_shapes=[pltpu.VMEM((flat_p, c), x.dtype)]),
        compiler_params=pltpu.CompilerParams(dimension_semantics=("parallel",)),
    )(xf)
    full = full.reshape(n, hwp, c)
    if hwp != hw:
        full = full[:, :hw, :]
    full = full.reshape(n, H, W, c)
    oh = (H - 1) // 2 + 1
    ow = (W - 1) // 2 + 1
    return full[:, :2 * oh:2, :2 * ow:2, :]


# ---------------------------------------------------------------------------
# head: global-avg-pool -> Conv1d(2048,256,1) -> ReLU -> (Dropout) -> Linear(256,65)
# ---------------------------------------------------------------------------
def _head_kernel(feat_ref, w1_ref, b1_ref, w2_ref, b2_ref, o_ref):
    hw = feat_ref.shape[1]
    pooled = jnp.sum(feat_ref[...].astype(jnp.float32), axis=1) * (1.0 / hw)
    h = jnp.dot(pooled.astype(w1_ref.dtype), w1_ref[...],
                preferred_element_type=jnp.float32) + b1_ref[...]
    h = jnp.maximum(h, 0.0)
    # TODO(synk): nn.Dropout(0.5) has no deterministic Pallas equivalent;
    # implemented with inference semantics (identity).
    o = jnp.dot(h.astype(w2_ref.dtype), w2_ref[...],
                preferred_element_type=jnp.float32) + b2_ref[...]
    o_ref[...] = o.astype(o_ref.dtype)


def head_forward(feat, hp, num_classes=65):
    B = feat.shape[0]
    ncp = hp["w2"].shape[1]
    out = pl.pallas_call(
        _head_kernel,
        out_shape=jax.ShapeDtypeStruct((B, ncp), jnp.float32),
    )(feat, hp["w1"], hp["b1"], hp["w2"], hp["b2"])
    return out[:, :num_classes]


# ---------------------------------------------------------------------------
# ResNet-50 bottleneck / forward
# ---------------------------------------------------------------------------
def bottleneck(x, p):
    out = conv1x1(x, p["conv1"], relu=True)
    if p["stride"] == 1:
        out = conv3x3_s1(out, p["conv2"], relu=True)
    else:
        out = conv_im2col(out, p["conv2"], k=3, stride=p["stride"], pad=1,
                          relu=True)
    if "down" in p:
        identity = conv1x1(x, p["down"], stride=p["stride"], relu=False)
    else:
        identity = x
    # conv3 (1x1) with the residual add + ReLU fused into its matmul epilogue
    return conv1x1(out, p["conv3"], relu=True, residual=identity)


def finetune_resnet_forward(x_nchw, params):
    x = jnp.transpose(x_nchw, (0, 2, 3, 1)).astype(jnp.bfloat16)  # NCHW -> NHWC
    x = conv_im2col(x, params["stem"], k=7, stride=2, pad=3, relu=True)
    x = maxpool_3x3_s2(x)
    for name in ("layer1", "layer2", "layer3", "layer4"):
        for blk in params[name]:
            x = bottleneck(x, blk)
    n, h, w, c = x.shape
    feat = x.reshape(n, h * w, c)                                 # (B, HW, 2048)
    return head_forward(feat, params["head"])                     # (B, 65)


# ---------------------------------------------------------------------------
# Deterministic parameter construction (synthetic, no checkpoint).
# Weights are stored bf16, pre-padded to the 128-multiple channel layout used
# by the activations, so the forward path has no per-call pads/slices.
# ---------------------------------------------------------------------------
class _Init:
    def __init__(self, seed):
        self._key = jax.random.PRNGKey(seed)
        self._n = 0

    def normal(self, shape, scale=1.0):
        self._n += 1
        k = jax.random.fold_in(self._key, self._n)
        return scale * jax.random.normal(k, shape, dtype=jnp.float32)


def _conv_bn_params(init, k, cin, cout, cin_store=None, k_rows=None, eps=1e-5):
    if cin_store is None:
        cin_store = _round_up(cin, 128)       # stored channel count of the input
    cout_p = _round_up(cout, 128)
    fan_in = k * k * cin
    w = init.normal((k, k, cin, cout), scale=math.sqrt(2.0 / fan_in))
    gamma = 1.0 + init.normal((cout,), scale=0.1)
    beta = init.normal((cout,), scale=0.1)
    running_mean = jnp.zeros((cout,), jnp.float32)
    running_var = jnp.ones((cout,), jnp.float32)
    scale = gamma / jnp.sqrt(running_var + eps)   # eval-mode BN folded into conv
    shift = beta - running_mean * scale
    w = w * scale
    w = jnp.pad(w, ((0, 0), (0, 0), (0, cin_store - cin), (0, cout_p - cout)))
    w = w.reshape(k * k * cin_store, cout_p)
    if k_rows is not None and k_rows > w.shape[0]:
        w = jnp.pad(w, ((0, k_rows - w.shape[0]), (0, 0)))
    w = w.astype(jnp.bfloat16)
    b = jnp.pad(shift, (0, cout_p - cout)).reshape(1, cout_p).astype(jnp.float32)
    return {"k": k, "w": w, "b": b}


def _bottleneck_params(init, inplanes, planes, stride, has_down):
    p = {"conv1": _conv_bn_params(init, 1, inplanes, planes),
         "conv2": _conv_bn_params(init, 3, planes, planes),
         "conv3": _conv_bn_params(init, 1, planes, planes * 4),
         "stride": stride}
    if has_down:
        p["down"] = _conv_bn_params(init, 1, inplanes, planes * 4)
    return p


def make_params(seed=0, num_classes=65):
    init = _Init(seed)
    # stem contraction dim padded 7*7*3=147 -> 256 for aligned, unmasked MXU K
    params = {"stem": _conv_bn_params(init, 7, 3, 64, cin_store=3, k_rows=256)}
    cfg = [("layer1", 64, 3, 1), ("layer2", 128, 4, 2),
           ("layer3", 256, 6, 2), ("layer4", 512, 3, 2)]
    inplanes = 64
    for name, planes, blocks, stride in cfg:
        layer = [_bottleneck_params(init, inplanes, planes, stride, True)]
        inplanes = planes * 4
        for _ in range(blocks - 1):
            layer.append(_bottleneck_params(init, inplanes, planes, 1, False))
        params[name] = layer
    ncp = _round_up(num_classes, 128)
    params["head"] = {
        # Conv1d(2048, 256, 1) weight (256,2048,1) stored transposed as (2048,256)
        "w1": init.normal((2048, 256),
                          scale=math.sqrt(2.0 / 2048)).astype(jnp.bfloat16),
        "b1": init.normal((1, 256), scale=0.01).astype(jnp.float32),
        # Linear(256, 65) weight (65,256) stored transposed & padded as (256,128)
        "w2": jnp.pad(init.normal((256, num_classes),
                                  scale=math.sqrt(1.0 / 256)),
                      ((0, 0), (0, ncp - num_classes))).astype(jnp.bfloat16),
        "b2": jnp.pad(init.normal((1, num_classes), scale=0.01),
                      ((0, 0), (0, ncp - num_classes))).astype(jnp.float32),
    }
    return params


# ---------------------------------------------------------------------------
if __name__ == "__main__":
    params = make_params(seed=0)
    x = jax.random.normal(jax.random.PRNGKey(0), (2, 3, 64, 64),
                          dtype=jnp.float32)
    out = jax.block_until_ready(finetune_resnet_forward(x, params))
    assert out.shape == (2, 65), out.shape
    assert bool(jnp.all(jnp.isfinite(out)))
    print("KERNEL_OK")
</pallas_src>

<mosaic_0001>
module attributes {stable_mosaic.version = 11 : i64} {
  func.func @_matmul_kernel(%arg0: i32, %arg1: i32, %arg2: memref<256x256xbf16, #tpu.memory_space<vmem>>, %arg3: memref<256x128xbf16, #tpu.memory_space<vmem>>, %arg4: memref<1x128xf32, #tpu.memory_space<vmem>>, %arg5: memref<256x128xbf16, #tpu.memory_space<vmem>>) attributes {dimension_semantics = [#tpu.dimension_semantics<parallel>, #tpu.dimension_semantics<parallel>], iteration_bounds = array<i64: 1, 8>, scalar_prefetch = 0 : i64, scratch_operands = 0 : i64, tpu.core_type = #tpu.core_type<tc>, window_params = [{transform_indices = @transform_0, window_bounds = array<i64: 256, 256>}, {transform_indices = @transform_1, window_bounds = array<i64: 256, 128>}, {transform_indices = @transform_2, window_bounds = array<i64: 1, 128>}, {transform_indices = @transform_3, window_bounds = array<i64: 256, 128>}]} {
    %c0 = arith.constant 0 : index
    %c0_0 = arith.constant 0 : index
    %0 = vector.load %arg2[%c0, %c0_0] : memref<256x256xbf16, #tpu.memory_space<vmem>>, vector<256x256xbf16>
    %c0_1 = arith.constant 0 : index
    %c0_2 = arith.constant 0 : index
    %1 = vector.load %arg3[%c0_1, %c0_2] : memref<256x128xbf16, #tpu.memory_space<vmem>>, vector<256x128xbf16>
    %cst = arith.constant dense<0.000000e+00> : vector<256x128xf32>
    %2 = tpu.matmul %0, %1, %cst {dimension_numbers = #tpu.dot_dimension_numbers<[1], [0], [0], [1], [0, 0, 1, 1], [], []>} : vector<256x256xbf16>, vector<256x128xbf16>, vector<256x128xf32> -> vector<256x128xf32>
    %c0_3 = arith.constant 0 : index
    %c0_4 = arith.constant 0 : index
    %3 = vector.load %arg4[%c0_3, %c0_4] : memref<1x128xf32, #tpu.memory_space<vmem>>, vector<1x128xf32>
    %4 = vector.broadcast %3 : vector<1x128xf32> to vector<256x128xf32>
    %5 = arith.addf %2, %4 : vector<256x128xf32>
    %cst_5 = arith.constant 0.000000e+00 : f32
    %6 = vector.broadcast %cst_5 : f32 to vector<256x128xf32>
    %7 = arith.maximumf %5, %6 : vector<256x128xf32>
    %8 = arith.truncf %7 : vector<256x128xf32> to vector<256x128xbf16>
    %c0_6 = arith.constant 0 : index
    %c0_7 = arith.constant 0 : index
    %9 = vector.load %arg5[%c0_6, %c0_7] : memref<256x128xbf16, #tpu.memory_space<vmem>>, vector<256x128xbf16>
    tpu.vector_store %arg5[%c0_6, %c0_7], %8 {strides = array<i32>} : memref<256x128xbf16, #tpu.memory_space<vmem>>, vector<256x128xbf16>,
    return
  }
  func.func @transform_0(%arg0: i32, %arg1: i32) -> (i32, i32) {
    %c0_i32 = arith.constant 0 : i32
    %c0_i32_0 = arith.constant 0 : i32
    return %arg1, %c0_i32 : i32, i32
  }
  func.func @transform_1(%arg0: i32, %arg1: i32) -> (i32, i32) {
    %c0_i32 = arith.constant 0 : i32
    %c0_i32_0 = arith.constant 0 : i32
    return %c0_i32, %arg0 : i32, i32
  }
  func.func @transform_2(%arg0: i32, %arg1: i32) -> (i32, i32) {
    %c0_i32 = arith.constant 0 : i32
    %c0_i32_0 = arith.constant 0 : i32
    return %c0_i32, %arg0 : i32, i32
  }
  func.func @transform_3(%arg0: i32, %arg1: i32) -> (i32, i32) {
    %c0_i32 = arith.constant 0 : i32
    return %arg1, %arg0 : i32, i32
  }
}

</mosaic_0001>

<bundles_post_ra>
// kernel: tpu_custom_call.1
= control target key start
LH: loop header
LB: loop body
LE: loop exit
PB: predicated region body
PF: predicated region fallthrough
CT: control target
= control target key end

     0   :  { %8 = vsyncpa [#allocation3], 0  ;;  %s1985_s0 = inlined_call_operand.hbm [shape: bf16[2048,256], index: 0, kind: input, shape index: {}]   ;;  %s1986_s1 = inlined_call_operand.hbm [shape: bf16[256,128], index: 1, kind: input, shape index: {}]   ;;  %s1987_s2 = inlined_call_operand.vmem [shape: f32[1,128], index: 2, kind: input, shape index: {}]   ;;  %s1988_s3 = inlined_call_operand.hbm [shape: bf16[2048,128], index: 3, kind: output, shape index: {}]  }
   0x1   :  { %10 = vsyncpa [#allocation3 + $0x1], 0 }
   0x2   :  { %11 = vsyncpa [#allocation6], 0 }
   0x3   :  { %12 = vsyncpa [#allocation4], 0 }
   0x4   :  { %14 = vsyncpa [#allocation4 + $0x1], 0  ;;  %s1715_s12 = smov 0   ;;  %s1717_s13 = smov 0  }
   0x5   :  { %s1719_s14 = smov 0   ;;  %s1721_s15 = smov 0  }
   0x6   :  { %s1723_s16 = smov 0   ;;  %s1725_s17 = smov 0  }
   0x7 LB: > { %s1045_s18 = sadd.s32 4294967295, %s1684_s17   ;;  %s1046_s19 = sadd.s32 4294967294, %s1684_s17   ;;  %s1684_s17 = sphi %s1725_s17, %s20_s17   ;;  %s1680_s16 = sphi %s1723_s16, %s2005_s16   ;;  %s1676_s15 = sphi %s1721_s15, %s2004_s15   ;;  %s1672_s14 = sphi %s1719_s14, %s2003_s14   ;;  %s1668_s13 = sphi %s1717_s13, %s2002_s13   ;;  %s1664_s12 = sphi %s1715_s12, %s2001_s12  }
   0x8   : > { %p52_p0 = scmp.ne.s32.totalorder %s1668_s13, %s1664_s12  ;;  %p1749_p1 = scmp.eq.s32.totalorder %s1045_s18, 0 }
   0x9   : > { %p1753_p2 = scmp.eq.s32.totalorder %s1045_s18, 7  ;;  %p136_p3 = scmp.eq.s32.totalorder %s1046_s19, 7 }
   0xa   : > { %p1759_p4 = por %p1749_p1, %p52_p0  ;;  %p1047_p5 = scmp.ge.s32.totalorder %s1684_s17, 1 }
   0xb   : > { %p1764_p6 = por %p136_p3, %p52_p0  ;;  %p143_p7 = scmp.lt.s32.totalorder %s1684_s17, 9 }
   0xc   : > { %s1686_s25 = smov [#allocation5]   ;;  %s29_s28 = sadd.s32 1, %s1680_s16 }
   0xd   : > { %s1993_s23 = scalar_select %p1764_p6, 1, 0 }
   0xe   : > { %p1769_p8 = pnand %p1047_p5, %p143_p7  ;;  %s157_s26 = sshll.u32 %s1686_s25, 4  ;;  %s158_s26 = int_to_ptr.vmem [resolvable:$true] %s157_s26 }
   0xf   : > { %s1557_s29 = scalar_lea.vmem %s158_s26, 2048  ;;  %p1565_p3 = scmp.lt.s32.totalorder %s158_s26, %s158_s26 }
  0x10   : > { %p1411_p9 = pneg %p1769_p8  ;;  %p1558_p12 = scmp.ne.s32.totalorder %s158_s26, %s1557_s29 }
  0x11   : > { %p1566_p5 = scmp.lt.s32.totalorder %s1557_s29, %s1557_s29 }
  0x12   : > { %p1777_p10 = pnand %p1411_p9, %p1749_p1 }
  0x13   : > { %p1567_p7 = por %p1566_p5, %p1565_p3 }
  0x14   : > { %p1548_p11 = pneg %p1777_p10 }
  0x16   : > { %p1560_p13 = pnand %p1558_p12, %p1548_p11 }
  0x18   : > { %p1561_p0 = pneg %p1560_p13 }
  0x1a   : > { %p1568_p6 = pnand %p1567_p7, %p1561_p0 }
  0x1c   : > { %1571 = shalt.err (!%p1568_p6)
}
  0x1d   : > { %s1687_s30 = smov 64   ;;  %s1688_s4 = smov 4  }
  0x1e   : > { %1414 = dma.hbm_to_vmem [thread:$0]  (!%p1777_p10), %s1986_s1, 2048, %s158_s26, [#allocation6], %s1687_s30, %s1687_s30, %s1688_s4  }
  0x1f   : > { %p30_p9 = scmp.ge.s32.totalorder %s29_s28, 8  ;;  %s39_s7 = sadd.s32 1, %s1672_s14 }
  0x20   : > { %p46_p6 = scmp.ne.s32.totalorder %s1672_s14, %s1668_s13  ;;  %p47_p11 = scmp.eq.s32.totalorder %s1684_s17, 0 }
  0x21   : > { %s2007_s28 = smov (%p30_p9, %s29_s28), 0  ;;  %p1424_p0 = scmp.lt.s32.totalorder %s1684_s17, 8 }
  0x22   : > { %p1795_p12 = por %p47_p11, %p46_p6  ;;  %p1801_p13 = por %p1753_p2, %p46_p6 }
  0x23   : > { %s36_s10 = ssub.s32 %s1680_s16, %s2007_s28  ;;  %s177_s11 = sand.u32 1, %s1672_s14  }
  0x24   : > { %s1997_s9 = scalar_select %p1801_p13, 1, 0 }
  0x25   : > { %p37_p10 = scmp.eq.s32.totalorder %s36_s10, 0  ;;  %s1051_s18 = sshll.u32 %s177_s11, 8 }
  0x26   : > { %s1146_s25 = sshll.u32 %s1680_s16, 12  ;;  %s181_s30 = scalar_lea.vmem [#allocation2], %s1051_s18 }
  0x27   : > { %s1810_s19 = scalar_select %p37_p10, %s1672_s14, %s39_s7  }
  0x28   : > { %s188_s29 = scalar_lea.hbm %s1985_s0, %s1146_s25  ;;  %s189_s4 = sshll.u32 %s181_s30, 4  ;;  %s190_s4 = int_to_ptr.vmem [resolvable:$true] %s189_s4 }
  0x29   : > { %p1818_p2 = pnand %p1424_p0, %p1795_p12  ;;  %s178_s5 = scalar_lea.sflag [#allocation3], %s177_s11 }
  0x2a   : > { %s1585_s6 = scalar_lea.vmem %s190_s4, 4096  ;;  %s1689_s7 = smov [#allocation2]  }
  0x2b   : > { %p1574_p3 = pneg %p1818_p2  ;;  %p1586_p5 = scmp.ne.s32.totalorder %s190_s4, %s1585_s6 }
  0x2c   : > { %s1590_s10 = sshll.u32 %s1689_s7, 4  ;;  %s1591_s10 = int_to_ptr.vmem [resolvable:$false] %s1590_s10 }
  0x2d   : > { %p1588_p7 = pnand %p1586_p5, %p1574_p3  ;;  %s1592_s25 = scalar_lea.vmem %s1591_s10, 8192 }
  0x2e   : > { %p1593_p6 = scmp.lt.s32.totalorder %s190_s4, %s1591_s10  ;;  %p1594_p11 = scmp.lt.s32.totalorder %s1592_s25, %s1585_s6 }
  0x2f   : > { %p1589_p9 = pneg %p1588_p7 }
  0x30   : > { %p1595_p10 = por %p1594_p11, %p1593_p6 }
  0x32   : > { %p1596_p13 = pnand %p1595_p10, %p1589_p9 }
  0x34   : > { %1599 = shalt.err (!%p1596_p13)
}
  0x35   : > { %s1690_s8 = smov 128   ;;  %s1691_s18 = smov 8  }
  0x36   : > { %1418 = dma.hbm_to_vmem [thread:$0]  (!%p1818_p2), %s188_s29, 4096, %s190_s4, %s178_s5, %s1690_s8, %s1690_s8, %s1691_s18  }
  0x37   : > { %201 = sbr.rel (%p1769_p8) target bundleno = 373 (0x175), region = 32  ;;  %s1829_s11 = sand.u32 (!%p1769_p8), 1, %s1668_s13  }
  0x38   : > { %s1056_s26 = sshll.u32 (!%p1769_p8), %s1829_s11, 8  ;;  %s204_s27 = scalar_lea.sflag (!%p1769_p8), [#allocation3], %s1829_s11 }
  0x39   : > { %s1833_s30 = scalar_lea.vmem (!%p1769_p8), [#allocation2], %s1056_s26 }
  0x3c   : > { %1651 = dma.done.wait (%p1759_p4), %s204_s27, 4096  }
  0x3d   : > { %1653 = vsyncadd (%p1759_p4), %s204_s27, 4294963200 }
  0x3e   : > { %1655 = dma.done.wait (%p1749_p1), [#allocation6], 2048  }
  0x3f   : > { %1657 = vsyncadd (%p1749_p1), [#allocation6], 4294965248  ;;  %v1482_v0 = vld [vmem:[#allocation5 + $0x78] sm:$0xff]   ;;  %v1484_v2 = vld [vmem:[#allocation5 + $0x70] sm:$0xff]   ;;  %s1058_s24 = sshll.u32 %s1829_s11, 7  ;;  %s1179_s4 = sshll.u32 %s1676_s15, 11 }
  0x40   : > { %v1483_v1 = vld [vmem:[#allocation5 + $0x38] sm:$0xff]   ;;  %1275 = vmatprep.subr.bf16.mxu0 %v1482_v0  ;;  %1387 = vmatprep.subr.bf16.mxu1 %v1482_v0  ;;  %v1485_v3 = vld [vmem:[#allocation5 + $0x30] sm:$0xff]   ;;  %v1486_v4 = vld [vmem:[#allocation5 + $0x68] sm:$0xff]   ;;  %s1887_s29 = scalar_lea.vmem [#allocation7], %s1058_s24  ;;  %s1934_s7 = scalar_lea.hbm %s1988_s3, %s1179_s4 }
  0x41   : > { %1276 = vmatpush3.bf16.msra.mxu0 %v1483_v1  ;;  %1395 = vmatpush3.bf16.msra.mxu1 %v1483_v1  ;;  %v1487_v5 = vld [vmem:[#allocation5 + $0x28] sm:$0xff]   ;;  %v1488_v6 = vld [vmem:[#allocation5 + $0x60] sm:$0xff]   ;;  %v1490_v8 = vld [vmem:[#allocation5 + $0x58] sm:$0xff]   ;;  %s938_s21 = sshll.u32 %s1887_s29, 4  ;;  %s924_s15 = scalar_lea.sflag [#allocation4], %s1829_s11  ;;  %s1936_s21 = int_to_ptr.vmem [resolvable:$true] %s938_s21 }
  0x42   : > { %1277 = vmatprep.subr.bf16.mxu0 %v1484_v2  ;;  %1388 = vmatprep.subr.bf16.mxu1 %v1484_v2  ;;  %v1489_v7 = vld [vmem:[#allocation5 + $0x20] sm:$0xff]   ;;  %v1491_v9 = vld [vmem:[#allocation5 + $0x18] sm:$0xff]   ;;  %v1492_v10 = vld [vmem:[#allocation5 + $0x50] sm:$0xff]   ;;  %s1600_s10 = scalar_lea.vmem %s1936_s21, 2048  ;;  %p1999_p4 = scmp.ne.s32.totalorder %s1997_s9, 0 }
  0x43   : > { %v1500_v11 = vld [vmem:[%s1833_s30 + $0x4] ss:$8 sps:$4 sm:$0xff]   ;;  %v1493_v13 = vld [vmem:[#allocation5 + $0x10] sm:$0xff]   ;;  %v1498_v18 = vld [vmem:[%s1833_s30] ss:$8 sps:$4 sm:$0xff]   ;;  %p1601_p1 = scmp.ne.s32.totalorder %s1936_s21, %s1600_s10  ;;  %s1692_s25 = smov [#allocation7]  }
  0x44   : > { %v1503_v12 = vld [vmem:[%s1833_s30 + $0x84] ss:$8 sps:$4 sm:$0xff]   ;;  %602 = vmatprep.mubr.bf16.mxu0 %v1500_v11  ;;  %v1501_v19 = vld [vmem:[%s1833_s30 + $0x80] ss:$8 sps:$4 sm:$0xff]   ;;  %v1504_v20 = vld [vmem:[%s1833_s30 + $0x14] ss:$8 sps:$4 sm:$0xff]  }
  0x45   : > { %1278 = vmatpush3.bf16.msra.mxu0 %v1485_v3  ;;  %1396 = vmatpush3.bf16.msra.mxu1 %v1485_v3  ;;  %v1494_v14 = vld [vmem:[#allocation5 + $0x48] sm:$0xff]   ;;  %v1496_v16 = vld [vmem:[#allocation5 + $0x40] sm:$0xff]   ;;  %v1506_v21 = vld [vmem:[%s1833_s30 + $0x94] ss:$8 sps:$4 sm:$0xff]   ;;  %p1602_p8 = pnand %p1601_p1, %p1999_p4  ;;  %s1604_s8 = sshll.u32 %s1692_s25, 4  ;;  %s1605_s8 = int_to_ptr.vmem [resolvable:$false] %s1604_s8 }
  0x46   : > { %1279 = vmatprep.subr.bf16.mxu0 %v1486_v4  ;;  %1389 = vmatprep.subr.bf16.mxu1 %v1486_v4  ;;  %v1495_v15 = vld [vmem:[#allocation5 + $0x8] sm:$0xff]   ;;  %v1497_v17 = vld [vmem:[#allocation5] sm:$0xff]   ;;  %v1508_v22 = vld [vmem:[%s1833_s30 + $0x10] ss:$8 sps:$4 sm:$0xff]   ;;  %s1606_s18 = scalar_lea.vmem %s1605_s8, 4096  ;;  %p1607_p13 = scmp.lt.s32.totalorder %s1936_s21, %s1605_s8 }
  0x47   : > { %666 = vmatprep.mubr.bf16.mxu1 %v1503_v12  ;;  %v1509_v23 = vld [vmem:[%s1833_s30 + $0x90] ss:$8 sps:$4 sm:$0xff]   ;;  %v1510_v24 = vld [vmem:[%s1833_s30 + $0x24] ss:$8 sps:$4 sm:$0xff]   ;;  %v1514_v26 = vld [vmem:[%s1833_s30 + $0x20] ss:$8 sps:$4 sm:$0xff]   ;;  %p1603_p12 = pneg %p1602_p8  ;;  %p1608_p0 = scmp.lt.s32.totalorder %s1606_s18, %s1600_s10 }
  0x48   : > { %v1512_v25 = vld [vmem:[%s1833_s30 + $0xa4] ss:$8 sps:$4 sm:$0xff]   ;;  %v1515_v27 = vld [vmem:[%s1833_s30 + $0xa0] ss:$8 sps:$4 sm:$0xff]   ;;  %v1516_v28 = vld [vmem:[%s1833_s30 + $0x34] ss:$8 sps:$4 sm:$0xff]  }
  0x49   : > { %1280 = vmatpush3.bf16.msra.mxu0 %v1487_v5  ;;  %1397 = vmatpush3.bf16.msra.mxu1 %v1487_v5  ;;  %v1518_v29 = vld [vmem:[%s1833_s30 + $0xb4] ss:$8 sps:$4 sm:$0xff]   ;;  %v1520_v30 = vld [vmem:[%s1833_s30 + $0x30] ss:$8 sps:$4 sm:$0xff]   ;;  %v1522_v32 = vld [vmem:[%s1833_s30 + $0x44] ss:$8 sps:$4 sm:$0xff]   ;;  %p1609_p2 = por %p1608_p0, %p1607_p13 }
  0x4a   : > { %1281 = vmatprep.subr.bf16.mxu0 %v1488_v6  ;;  %1390 = vmatprep.subr.bf16.mxu1 %v1488_v6  ;;  %v1521_v31 = vld [vmem:[%s1833_s30 + $0xb0] ss:$8 sps:$4 sm:$0xff]   ;;  %v1524_v33 = vld [vmem:[%s1833_s30 + $0xc4] ss:$8 sps:$4 sm:$0xff]   ;;  %v1526_v34 = vld [vmem:[%s1833_s30 + $0x40] ss:$8 sps:$4 sm:$0xff]  }
  0x4b   : > { %v1527_v35 = vld [vmem:[%s1833_s30 + $0xc0] ss:$8 sps:$4 sm:$0xff]   ;;  %v1528_v36 = vld [vmem:[%s1833_s30 + $0x54] ss:$8 sps:$4 sm:$0xff]   ;;  %v1532_v38 = vld [vmem:[%s1833_s30 + $0x50] ss:$8 sps:$4 sm:$0xff]   ;;  %p1610_p3 = pnand %p1609_p2, %p1603_p12 }
  0x4c   : > { %v1530_v37 = vld [vmem:[%s1833_s30 + $0xd4] ss:$8 sps:$4 sm:$0xff]   ;;  %v1533_v39 = vld [vmem:[%s1833_s30 + $0xd0] ss:$8 sps:$4 sm:$0xff]   ;;  %v1534_v40 = vld [vmem:[%s1833_s30 + $0x64] ss:$8 sps:$4 sm:$0xff]  }
  0x4d   : > { %1282 = vmatpush3.bf16.msra.mxu0 %v1489_v7  ;;  %1398 = vmatpush3.bf16.msra.mxu1 %v1489_v7  ;;  %v1536_v41 = vld [vmem:[%s1833_s30 + $0xe4] ss:$8 sps:$4 sm:$0xff]   ;;  %v1538_v42 = vld [vmem:[%s1833_s30 + $0x60] ss:$8 sps:$4 sm:$0xff]   ;;  %v1540_v44 = vld [vmem:[%s1833_s30 + $0x74] ss:$8 sps:$4 sm:$0xff]  }
  0x4e   : > { %1283 = vmatprep.subr.bf16.mxu0 %v1490_v8  ;;  %1391 = vmatprep.subr.bf16.mxu1 %v1490_v8  ;;  %v1539_v43 = vld [vmem:[%s1833_s30 + $0xe0] ss:$8 sps:$4 sm:$0xff]   ;;  %v1542_v45 = vld [vmem:[%s1833_s30 + $0xf4] ss:$8 sps:$4 sm:$0xff]   ;;  %v1544_v46 = vld [vmem:[%s1833_s30 + $0x70] ss:$8 sps:$4 sm:$0xff]  }
  0x4f   : > { %v1545_v47 = vld [vmem:[%s1833_s30 + $0xf0] ss:$8 sps:$4 sm:$0xff]   ;;  %v1878_v52 = vld [vmem:[%s1987_s2] ss:$0 sm:$0xff] }
  0x51   : > { %1284 = vmatpush3.bf16.msra.mxu0 %v1491_v9  ;;  %1399 = vmatpush3.bf16.msra.mxu1 %v1491_v9 }
  0x52   : > { %1285 = vmatprep.subr.bf16.mxu0 %v1492_v10  ;;  %1392 = vmatprep.subr.bf16.mxu1 %v1492_v10 }
  0x55   : > { %1286 = vmatpush3.bf16.msra.mxu0 %v1493_v13  ;;  %1400 = vmatpush3.bf16.msra.mxu1 %v1493_v13 }
  0x56   : > { %1287 = vmatprep.subr.bf16.mxu0 %v1494_v14  ;;  %1393 = vmatprep.subr.bf16.mxu1 %v1494_v14 }
  0x59   : > { %1288 = vmatpush3.bf16.msra.mxu0 %v1495_v15  ;;  %1401 = vmatpush3.bf16.msra.mxu1 %v1495_v15 }
  0x5a   : > { %1289 = vmatprep.subr.bf16.mxu0 %v1496_v16  ;;  %1394 = vmatprep.subr.bf16.mxu1 %v1496_v16 }
  0x5d   : > { %1290 = vmatpush3.bf16.msra.mxu0 %v1497_v17  ;;  %1402 = vmatpush3.bf16.msra.mxu1 %v1497_v17 }
  0x60   : > { %603 = vmatmul.mubr.bf16.vlgmr.msra.gmra.mxu0 %v1498_v18  ;;  %667 = vmatmul.mubr.bf16.vlgmr.msra.gmra.mxu1 %v1501_v19 }
  0x61   : > { %610 = vmatprep.mubr.bf16.mxu0 %v1504_v20  ;;  %674 = vmatprep.mubr.bf16.mxu1 %v1506_v21 }
  0x68   : > { %611 = vmatmul.mubr.bf16.gmra.mxu0 %v1508_v22  ;;  %675 = vmatmul.mubr.bf16.gmra.mxu1 %v1509_v23 }
  0x69   : > { %618 = vmatprep.mubr.bf16.mxu0 %v1510_v24  ;;  %682 = vmatprep.mubr.bf16.mxu1 %v1512_v25 }
  0x70   : > { %619 = vmatmul.mubr.bf16.gmra.mxu0 %v1514_v26  ;;  %683 = vmatmul.mubr.bf16.gmra.mxu1 %v1515_v27 }
  0x71   : > { %626 = vmatprep.mubr.bf16.mxu0 %v1516_v28  ;;  %690 = vmatprep.mubr.bf16.mxu1 %v1518_v29 }
  0x78   : > { %627 = vmatmul.mubr.bf16.gmra.mxu0 %v1520_v30  ;;  %691 = vmatmul.mubr.bf16.gmra.mxu1 %v1521_v31 }
  0x79   : > { %634 = vmatprep.mubr.bf16.mxu0 %v1522_v32  ;;  %698 = vmatprep.mubr.bf16.mxu1 %v1524_v33 }
  0x80   : > { %635 = vmatmul.mubr.bf16.gmra.mxu0 %v1526_v34  ;;  %699 = vmatmul.mubr.bf16.gmra.mxu1 %v1527_v35 }
  0x81   : > { %642 = vmatprep.mubr.bf16.mxu0 %v1528_v36  ;;  %706 = vmatprep.mubr.bf16.mxu1 %v1530_v37 }
  0x88   : > { %643 = vmatmul.mubr.bf16.gmra.mxu0 %v1532_v38  ;;  %707 = vmatmul.mubr.bf16.gmra.mxu1 %v1533_v39 }
  0x89   : > { %650 = vmatprep.mubr.bf16.mxu0 %v1534_v40  ;;  %714 = vmatprep.mubr.bf16.mxu1 %v1536_v41 }
  0x90   : > { %651 = vmatmul.mubr.bf16.gmra.mxu0 %v1538_v42  ;;  %715 = vmatmul.mubr.bf16.gmra.mxu1 %v1539_v43 }
  0x91   : > { %658 = vmatprep.mubr.bf16.mxu0 %v1540_v44  ;;  %722 = vmatprep.mubr.bf16.mxu1 %v1542_v45 }
  0x98   : > { %659 = vmatmul.mubr.bf16.gmra.mxu0 %v1544_v46  ;;  %723 = vmatmul.mubr.bf16.gmra.mxu1 %v1545_v47 }
 0x120   : > { %v1291_v48 = vpop.f32.mrf.mxu0  ;;  %v1339_v49 = vpop.f32.mrf.mxu1 }
 0x122   : > { %v1292_v50 = vpop.f32.mrf.mxu0  ;;  %v1340_v51 = vpop.f32.mrf.mxu1 }
 0x123   : > { %v1293_v53 = vadd.f32 %v1292_v50, %v1291_v48  ;;  %v1341_v54 = vadd.f32 %v1340_v51, %v1339_v49 }
 0x124   : > { %v1294_v55 = vpop.f32.mrf.mxu0  ;;  %v1342_v56 = vpop.f32.mrf.mxu1 }
 0x125   : > { %v605_v57 = vadd.f32 %v1293_v53, %v1878_v52  ;;  %v669_v58 = vadd.f32 %v1341_v54, %v1878_v52 }
 0x126   : > { %v1295_v59 = vpop.f32.mrf.mxu0  ;;  %v1343_v60 = vpop.f32.mrf.mxu1 }
 0x127   : > { %v1296_v61 = vadd.f32 %v1295_v59, %v1294_v55  ;;  %v1344_v62 = vadd.f32 %v1343_v60, %v1342_v56  ;;  %v731_v3 = vmax.f32 %v605_v57, 0.0  ;;  %v747_v4 = vmax.f32 %v669_v58, 0.0 }
 0x128   : > { %v1297_v63 = vpop.f32.mrf.mxu0  ;;  %v1345_v0 = vpop.f32.mrf.mxu1 }
 0x129   : > { %v608_v1 = vadd.f32 %v1296_v61, %v1878_v52  ;;  %v672_v2 = vadd.f32 %v1344_v62, %v1878_v52 }
 0x12a   : > { %v1298_v5 = vpop.f32.mrf.mxu0  ;;  %v1346_v6 = vpop.f32.mrf.mxu1 }
 0x12b   : > { %v732_v7 = vmax.f32 %v608_v1, 0.0  ;;  %v748_v8 = vmax.f32 %v672_v2, 0.0  ;;  %v1299_v9 = vadd.f32 %v1298_v5, %v1297_v63  ;;  %v1347_v10 = vadd.f32 %v1346_v6, %v1345_v0 }
 0x12c   : > { %v1300_v11 = vpop.f32.mrf.mxu0  ;;  %v1348_v12 = vpop.f32.mrf.mxu1 }
 0x12d   : > { %v1183_v13 = vpack.c.bf16 %v732_v7, %v731_v3  ;;  %v1223_v14 = vpack.c.bf16 %v748_v8, %v747_v4  ;;  %v613_v15 = vadd.f32 %v1299_v9, %v1878_v52  ;;  %v677_v16 = vadd.f32 %v1347_v10, %v1878_v52 }
 0x12e   : > { %v1301_v17 = vpop.f32.mrf.mxu0  ;;  %v1349_v18 = vpop.f32.mrf.mxu1 }
 0x12f   : > { %1184 = vst [vmem:[%s1887_s29] sm:$0xff] %v1183_v13   ;;  %1267 = vst [vmem:[%s1887_s29 + $0x40] sm:$0xff] %v1223_v14   ;;  %v1302_v19 = vadd.f32 %v1301_v17, %v1300_v11  ;;  %v1350_v20 = vadd.f32 %v1349_v18, %v1348_v12  ;;  %v733_v25 = vmax.f32 %v613_v15, 0.0  ;;  %v749_v26 = vmax.f32 %v677_v16, 0.0 }
 0x130   : > { %v1303_v21 = vpop.f32.mrf.mxu0  ;;  %v1351_v22 = vpop.f32.mrf.mxu1 }
 0x131   : > { %v616_v23 = vadd.f32 %v1302_v19, %v1878_v52  ;;  %v680_v24 = vadd.f32 %v1350_v20, %v1878_v52 }
 0x132   : > { %v1304_v27 = vpop.f32.mrf.mxu0  ;;  %v1352_v28 = vpop.f32.mrf.mxu1 }
 0x133   : > { %v734_v29 = vmax.f32 %v616_v23, 0.0  ;;  %v750_v30 = vmax.f32 %v680_v24, 0.0  ;;  %v1305_v31 = vadd.f32 %v1304_v27, %v1303_v21  ;;  %v1353_v32 = vadd.f32 %v1352_v28, %v1351_v22 }
 0x134   : > { %v1306_v33 = vpop.f32.mrf.mxu0  ;;  %v1354_v34 = vpop.f32.mrf.mxu1 }
 0x135   : > { %v1188_v35 = vpack.c.bf16 %v734_v29, %v733_v25  ;;  %v1228_v36 = vpack.c.bf16 %v750_v30, %v749_v26  ;;  %v621_v37 = vadd.f32 %v1305_v31, %v1878_v52  ;;  %v685_v38 = vadd.f32 %v1353_v32, %v1878_v52 }
 0x136   : > { %v1307_v39 = vpop.f32.mrf.mxu0  ;;  %v1355_v40 = vpop.f32.mrf.mxu1 }
 0x137   : > { %1260 = vst [vmem:[%s1887_s29 + $0x8] sm:$0xff] %v1188_v35   ;;  %1268 = vst [vmem:[%s1887_s29 + $0x48] sm:$0xff] %v1228_v36   ;;  %v1308_v41 = vadd.f32 %v1307_v39, %v1306_v33  ;;  %v1356_v42 = vadd.f32 %v1355_v40, %v1354_v34  ;;  %v735_v47 = vmax.f32 %v621_v37, 0.0  ;;  %v751_v48 = vmax.f32 %v685_v38, 0.0 }
 0x138   : > { %v1309_v43 = vpop.f32.mrf.mxu0  ;;  %v1357_v44 = vpop.f32.mrf.mxu1 }
 0x139   : > { %v624_v45 = vadd.f32 %v1308_v41, %v1878_v52  ;;  %v688_v46 = vadd.f32 %v1356_v42, %v1878_v52 }
 0x13a   : > { %v1310_v49 = vpop.f32.mrf.mxu0  ;;  %v1358_v50 = vpop.f32.mrf.mxu1 }
 0x13b   : > { %v736_v51 = vmax.f32 %v624_v45, 0.0  ;;  %v752_v53 = vmax.f32 %v688_v46, 0.0  ;;  %v1311_v54 = vadd.f32 %v1310_v49, %v1309_v43  ;;  %v1359_v55 = vadd.f32 %v1358_v50, %v1357_v44 }
 0x13c   : > { %v1312_v56 = vpop.f32.mrf.mxu0  ;;  %v1360_v57 = vpop.f32.mrf.mxu1 }
 0x13d   : > { %v1193_v58 = vpack.c.bf16 %v736_v51, %v735_v47  ;;  %v1233_v59 = vpack.c.bf16 %v752_v53, %v751_v48  ;;  %v629_v60 = vadd.f32 %v1311_v54, %v1878_v52  ;;  %v693_v61 = vadd.f32 %v1359_v55, %v1878_v52 }
 0x13e   : > { %v1313_v62 = vpop.f32.mrf.mxu0  ;;  %v1361_v63 = vpop.f32.mrf.mxu1 }
 0x13f   : > { %1261 = vst [vmem:[%s1887_s29 + $0x10] sm:$0xff] %v1193_v58   ;;  %1269 = vst [vmem:[%s1887_s29 + $0x50] sm:$0xff] %v1233_v59   ;;  %v1314_v0 = vadd.f32 %v1313_v62, %v1312_v56  ;;  %v1362_v1 = vadd.f32 %v1361_v63, %v1360_v57  ;;  %v737_v6 = vmax.f32 %v629_v60, 0.0  ;;  %v753_v7 = vmax.f32 %v693_v61, 0.0 }
 0x140   : > { %v1315_v2 = vpop.f32.mrf.mxu0  ;;  %v1363_v3 = vpop.f32.mrf.mxu1 }
 0x141   : > { %v632_v4 = vadd.f32 %v1314_v0, %v1878_v52  ;;  %v696_v5 = vadd.f32 %v1362_v1, %v1878_v52 }
 0x142   : > { %v1316_v8 = vpop.f32.mrf.mxu0  ;;  %v1364_v9 = vpop.f32.mrf.mxu1 }
 0x143   : > { %v738_v10 = vmax.f32 %v632_v4, 0.0  ;;  %v754_v11 = vmax.f32 %v696_v5, 0.0  ;;  %v1317_v12 = vadd.f32 %v1316_v8, %v1315_v2  ;;  %v1365_v13 = vadd.f32 %v1364_v9, %v1363_v3 }
 0x144   : > { %v1318_v14 = vpop.f32.mrf.mxu0  ;;  %v1366_v15 = vpop.f32.mrf.mxu1 }
 0x145   : > { %v1198_v16 = vpack.c.bf16 %v738_v10, %v737_v6  ;;  %v1238_v17 = vpack.c.bf16 %v754_v11, %v753_v7  ;;  %v637_v18 = vadd.f32 %v1317_v12, %v1878_v52  ;;  %v701_v19 = vadd.f32 %v1365_v13, %v1878_v52 }
 0x146   : > { %v1319_v20 = vpop.f32.mrf.mxu0  ;;  %v1367_v21 = vpop.f32.mrf.mxu1 }
 0x147   : > { %1262 = vst [vmem:[%s1887_s29 + $0x18] sm:$0xff] %v1198_v16   ;;  %1270 = vst [vmem:[%s1887_s29 + $0x58] sm:$0xff] %v1238_v17   ;;  %v1320_v22 = vadd.f32 %v1319_v20, %v1318_v14  ;;  %v1368_v23 = vadd.f32 %v1367_v21, %v1366_v15  ;;  %v739_v28 = vmax.f32 %v637_v18, 0.0  ;;  %v755_v29 = vmax.f32 %v701_v19, 0.0 }
 0x148   : > { %v1321_v24 = vpop.f32.mrf.mxu0  ;;  %v1369_v25 = vpop.f32.mrf.mxu1 }
 0x149   : > { %v640_v26 = vadd.f32 %v1320_v22, %v1878_v52  ;;  %v704_v27 = vadd.f32 %v1368_v23, %v1878_v52 }
 0x14a   : > { %v1322_v30 = vpop.f32.mrf.mxu0  ;;  %v1370_v31 = vpop.f32.mrf.mxu1 }
 0x14b   : > { %v740_v32 = vmax.f32 %v640_v26, 0.0  ;;  %v756_v33 = vmax.f32 %v704_v27, 0.0  ;;  %v1323_v34 = vadd.f32 %v1322_v30, %v1321_v24  ;;  %v1371_v35 = vadd.f32 %v1370_v31, %v1369_v25 }
 0x14c   : > { %v1324_v36 = vpop.f32.mrf.mxu0  ;;  %v1372_v37 = vpop.f32.mrf.mxu1 }
 0x14d   : > { %v1203_v38 = vpack.c.bf16 %v740_v32, %v739_v28  ;;  %v1243_v39 = vpack.c.bf16 %v756_v33, %v755_v29  ;;  %v645_v40 = vadd.f32 %v1323_v34, %v1878_v52  ;;  %v709_v41 = vadd.f32 %v1371_v35, %v1878_v52 }
 0x14e   : > { %v1325_v42 = vpop.f32.mrf.mxu0  ;;  %v1373_v43 = vpop.f32.mrf.mxu1 }
 0x14f   : > { %1263 = vst [vmem:[%s1887_s29 + $0x20] sm:$0xff] %v1203_v38   ;;  %1271 = vst [vmem:[%s1887_s29 + $0x60] sm:$0xff] %v1243_v39   ;;  %v1326_v44 = vadd.f32 %v1325_v42, %v1324_v36  ;;  %v1374_v45 = vadd.f32 %v1373_v43, %v1372_v37  ;;  %v741_v50 = vmax.f32 %v645_v40, 0.0  ;;  %v757_v51 = vmax.f32 %v709_v41, 0.0 }
 0x150   : > { %v1327_v46 = vpop.f32.mrf.mxu0  ;;  %v1375_v47 = vpop.f32.mrf.mxu1 }
 0x151   : > { %v648_v48 = vadd.f32 %v1326_v44, %v1878_v52  ;;  %v712_v49 = vadd.f32 %v1374_v45, %v1878_v52 }
 0x152   : > { %v1328_v53 = vpop.f32.mrf.mxu0  ;;  %v1376_v54 = vpop.f32.mrf.mxu1 }
 0x153   : > { %v742_v55 = vmax.f32 %v648_v48, 0.0  ;;  %v758_v56 = vmax.f32 %v712_v49, 0.0  ;;  %v1329_v57 = vadd.f32 %v1328_v53, %v1327_v46  ;;  %v1377_v58 = vadd.f32 %v1376_v54, %v1375_v47 }
 0x154   : > { %v1330_v59 = vpop.f32.mrf.mxu0  ;;  %v1378_v60 = vpop.f32.mrf.mxu1 }
 0x155   : > { %v1208_v61 = vpack.c.bf16 %v742_v55, %v741_v50  ;;  %v1248_v62 = vpack.c.bf16 %v758_v56, %v757_v51  ;;  %v653_v63 = vadd.f32 %v1329_v57, %v1878_v52  ;;  %v717_v0 = vadd.f32 %v1377_v58, %v1878_v52 }
 0x156   : > { %v1331_v1 = vpop.f32.mrf.mxu0  ;;  %v1379_v2 = vpop.f32.mrf.mxu1 }
 0x157   : > { %1264 = vst [vmem:[%s1887_s29 + $0x28] sm:$0xff] %v1208_v61   ;;  %1272 = vst [vmem:[%s1887_s29 + $0x68] sm:$0xff] %v1248_v62   ;;  %v1332_v3 = vadd.f32 %v1331_v1, %v1330_v59  ;;  %v1380_v4 = vadd.f32 %v1379_v2, %v1378_v60  ;;  %v743_v9 = vmax.f32 %v653_v63, 0.0  ;;  %v759_v10 = vmax.f32 %v717_v0, 0.0 }
 0x158   : > { %v1333_v5 = vpop.f32.mrf.mxu0  ;;  %v1381_v6 = vpop.f32.mrf.mxu1 }
 0x159   : > { %v656_v7 = vadd.f32 %v1332_v3, %v1878_v52  ;;  %v720_v8 = vadd.f32 %v1380_v4, %v1878_v52 }
 0x15a   : > { %v1334_v11 = vpop.f32.mrf.mxu0  ;;  %v1382_v12 = vpop.f32.mrf.mxu1 }
 0x15b   : > { %v744_v13 = vmax.f32 %v656_v7, 0.0  ;;  %v760_v14 = vmax.f32 %v720_v8, 0.0  ;;  %v1335_v15 = vadd.f32 %v1334_v11, %v1333_v5  ;;  %v1383_v16 = vadd.f32 %v1382_v12, %v1381_v6 }
 0x15c   : > { %v1336_v17 = vpop.f32.mrf.mxu0  ;;  %v1384_v18 = vpop.f32.mrf.mxu1 }
 0x15d   : > { %v1213_v19 = vpack.c.bf16 %v744_v13, %v743_v9  ;;  %v1253_v20 = vpack.c.bf16 %v760_v14, %v759_v10  ;;  %v661_v23 = vadd.f32 %v1335_v15, %v1878_v52  ;;  %v725_v24 = vadd.f32 %v1383_v16, %v1878_v52 }
 0x15e   : > { %v1337_v21 = vpop.f32.mrf.mxu0  ;;  %v1385_v22 = vpop.f32.mrf.mxu1 }
 0x15f   : > { %1265 = vst [vmem:[%s1887_s29 + $0x30] sm:$0xff] %v1213_v19   ;;  %1273 = vst [vmem:[%s1887_s29 + $0x70] sm:$0xff] %v1253_v20   ;;  %v1338_v25 = vadd.f32 %v1337_v21, %v1336_v17  ;;  %v1386_v26 = vadd.f32 %v1385_v22, %v1384_v18  ;;  %v745_v29 = vmax.f32 %v661_v23, 0.0  ;;  %v761_v30 = vmax.f32 %v725_v24, 0.0 }
 0x161   : > { %v664_v27 = vadd.f32 %v1338_v25, %v1878_v52  ;;  %v728_v28 = vadd.f32 %v1386_v26, %v1878_v52 }
 0x163   : > { %v746_v31 = vmax.f32 %v664_v27, 0.0  ;;  %v762_v32 = vmax.f32 %v728_v28, 0.0 }
 0x165   : > { %v1218_v33 = vpack.c.bf16 %v746_v31, %v745_v29  ;;  %v1258_v34 = vpack.c.bf16 %v762_v32, %v761_v30 }
 0x167   : > { %1266 = vst [vmem:[%s1887_s29 + $0x38] sm:$0xff] %v1218_v33   ;;  %1274 = vst [vmem:[%s1887_s29 + $0x78] sm:$0xff] %v1258_v34  }
 0x168   : > { %1613 = shalt.err (!%p1610_p3)
}
 0x169   : > { %s1614_s26 = scalar_lea.hbm %s1934_s7, 2048  ;;  %s1618_s20 = scalar_lea.hbm %s1988_s3, 16384 }
 0x16a   : > { %p1615_p5 = scmp.ne.s32.totalorder %s1934_s7, %s1614_s26  ;;  %p1619_p6 = scmp.lt.s32.totalorder %s1934_s7, %s1988_s3 }
 0x16b   : > { %p1620_p11 = scmp.lt.s32.totalorder %s1618_s20, %s1614_s26 }
 0x16c   : > { %p1616_p7 = pnand %p1615_p5, %p1999_p4 }
 0x16d   : > { %p1621_p10 = por %p1620_p11, %p1619_p6 }
 0x16e   : > { %p1617_p9 = pneg %p1616_p7 }
 0x170   : > { %p1622_p1 = pnand %p1621_p10, %p1617_p9 }
 0x172   : > { %1625 = shalt.err (!%p1622_p1)
}
 0x173   : > { %s1693_s29 = smov 64   ;;  %s1694_s4 = smov 4  }
 0x174   : > { %1409 = dma.vmem_to_hbm [thread:$0]  (%p1999_p4), %s1936_s21, 2048, %s1934_s7, %s924_s15, %s1693_s29, %s1693_s29, %s1694_s4  }
 0x175 PF: > { %p1426_p8 = scmp.ge.s32.totalorder %s1684_s17, 2  ;;  %s953_s5 = sand.u32 1, %s1664_s12  }
 0x176   : > { %p2000_p12 = scmp.ne.s32.totalorder %s1993_s23, 0  ;;  %s954_s6 = scalar_lea.sflag [#allocation4], %s953_s5 }
 0x178   : > { %p1420_p13 = pnand %p1426_p8, %p2000_p12 }
 0x17a   : > { %p1421_p0 = pneg %p1420_p13 }
 0x17c   : > { %1659 = dma.done.wait (%p1421_p0), %s954_s6, 2048  }
 0x17d   : > { %1661 = vsyncadd (%p1421_p0), %s954_s6, 4294965248  ;;  %s20_s17 = sadd.s32 1, %s1684_s17   ;;  %s2001_s12 = smov %s1668_s13 }
 0x17e   : > { %p17_p2 = scmp.ge.s32.totalorder %s20_s17, 10   ;;  %s2002_s13 = smov %s1672_s14 }
 0x17f   : > { %s2003_s14 = smov %s1810_s19  ;;  %s2004_s15 = smov %s1680_s16 }
 0x180   : > { %s2005_s16 = smov %s2007_s28  ;;  %19 = sbr.rel (!%p17_p2) target bundleno = 7 (0x7), region = 85 }
 0x185   :  { %959 = vsyncpa [#allocation3], 1 }
 0x186   :  { %961 = vsyncpa [#allocation3 + $0x1], 1 }
 0x187   :  { %962 = vsyncpa [#allocation6], 1 }
 0x188   :  { %963 = vsyncpa [#allocation4], 1 }
 0x189   :  { %965 = vsyncpa [#allocation4 + $0x1], 1 }

</bundles_post_ra>
